<compile_context>
chip_gen: v7x
topology: tpu7x:2x2x1
jax: 0.10.0
libtpu: 0.0.40
codegen_flags: <defaults>
</compile_context>

<pallas_src>
import functools

import jax
import jax.numpy as jnp
import numpy as np
from jax.experimental import pallas as pl
from jax.experimental.pallas import tpu as pltpu

# ---- module hyper-parameters (static) --------------------------------------
CHANNELS = 8
KERNEL_SIZE = 3                      # NOTE: tap construction below assumes 3
DILATIONS = [[1, 3], [5]]            # list[list[int]] as in the PyTorch module
SLOPE = 0.1                          # LeakyReLU negative slope

N_LAYERS = sum(len(dr) for dr in DILATIONS)
RF_HALO = sum(d for dr in DILATIONS for d in dr)   # total receptive field/side = 9
HALO_LANES = 128                     # halo block width (lane aligned, >= RF_HALO)
MAX_TILE_L = 2048                    # default lane tile for long sequences


def _residual_block_kernel(xl_ref, xc_ref, xr_ref, w_ref, b_ref, o_ref, *,
                           L, tile_l):
    """One (batch element, L-tile) grid step.

    xl_ref : (C, 128)              left-halo 128-block (clamped at t=0)
    xc_ref : (C, tile_l)           central tile
    xr_ref : (C, 128)              right-halo 128-block (clamped at the end)
    w_ref  : (N_LAYERS*K, C, C)    per-tap weight matrices (C_out, C_in)
    b_ref  : (N_LAYERS, C, 1)      biases
    o_ref  : (C, tile_l)           output tile
    """
    C = CHANNELS
    H = HALO_LANES
    W = tile_l + 2 * H

    li = pl.program_id(1)
    # Global time index of every window lane (row vector, broadcasts over C).
    t0 = li * tile_l - H
    t = t0 + jax.lax.broadcasted_iota(jnp.int32, (1, W), 1)

    # Widened working window (halo + center + halo), all lane-aligned pieces.
    x = jnp.concatenate(
        [xl_ref[...], xc_ref[...], xr_ref[...]], axis=-1).astype(jnp.float32)
    w = w_ref[...]          # hoisted once: all weights live in a few vregs
    b = b_ref[...]

    layer = 0
    for dr in DILATIONS:                       # unrolled (static)
        residual = x
        for d in dr:
            h = jnp.where(x > 0, x, SLOPE * x)           # LeakyReLU (VPU)
            # Dilation-shifted taps via lane rotation (XLU) + zero-pad masks
            # keyed on the *global* time index (conv edge / tile-halo / padded
            # tail all handled by the same mask).
            tap_prev = jnp.where(t >= d, pltpu.roll(h, d, axis=1), 0.0)
            tap_next = jnp.where(t < L - d, pltpu.roll(h, W - d, axis=1), 0.0)
            x = (jnp.dot(w[layer * KERNEL_SIZE + 0], tap_prev,
                         preferred_element_type=jnp.float32)
                 + jnp.dot(w[layer * KERNEL_SIZE + 1], h,
                           preferred_element_type=jnp.float32)
                 + jnp.dot(w[layer * KERNEL_SIZE + 2], tap_next,
                           preferred_element_type=jnp.float32)
                 + b[layer])
            layer += 1
        x = residual + x

    # Only the central tile is exact -> write it; halo is recompute scratch.
    o_ref[...] = x[:, H:H + tile_l].astype(o_ref.dtype)


def residual_block(x, weights, biases, *, tile_l=None):
    """x: (N, C, L) f32; weights: (N_LAYERS, C, C, K) torch layout; biases: (N_LAYERS, C)."""
    N, C, L = x.shape
    assert C == CHANNELS
    assert weights.shape == (N_LAYERS, C, C, KERNEL_SIZE)

    if tile_l is None:
        tile_l = min(MAX_TILE_L, ((L + 127) // 128) * 128)
    assert tile_l % 128 == 0 and tile_l >= HALO_LANES

    # Pad L to a multiple of tile_l.  Kernel masks use the *true* L, so the
    # padded tail never contaminates kept outputs.
    Lp = ((L + tile_l - 1) // tile_l) * tile_l
    xp = x if Lp == L else jnp.pad(x, ((0, 0), (0, 0), (0, Lp - L)))

    n_tiles = Lp // tile_l
    tpb = tile_l // 128          # 128-blocks per tile
    l_blocks = Lp // 128         # 128-blocks along (padded) L

    # Per-tap weight matrices: w_taps[layer*K + k] = W[layer, :, :, k] (C_out, C_in)
    w_taps = jnp.transpose(weights, (0, 3, 1, 2)).reshape(
        N_LAYERS * KERNEL_SIZE, C, C)
    b_kern = biases[:, :, None]                # (N_LAYERS, C, 1)

    kernel = functools.partial(_residual_block_kernel, L=L, tile_l=tile_l)

    flops = (2 * N_LAYERS * KERNEL_SIZE * C * C + 6 * N_LAYERS * C + 2 * C) * N * Lp
    bytes_accessed = 4 * (N * C * (Lp + 2 * HALO_LANES * n_tiles)   # x + halo re-reads
                          + N * C * Lp                              # output
                          + N_LAYERS * C * (KERNEL_SIZE * C + 1))   # params

    out = pl.pallas_call(
        kernel,
        out_shape=jax.ShapeDtypeStruct((N, C, Lp), x.dtype),
        grid=(N, n_tiles),
        in_specs=[
            # left halo: previous 128-block (clamped at the start; masked in-kernel)
            pl.BlockSpec((None, C, HALO_LANES),
                         lambda n, l: (n, 0, jnp.maximum(l * tpb - 1, 0))),
            # central tile
            pl.BlockSpec((None, C, tile_l), lambda n, l: (n, 0, l)),
            # right halo: next 128-block (clamped at the end; masked in-kernel)
            pl.BlockSpec((None, C, HALO_LANES),
                         lambda n, l: (n, 0, jnp.minimum(l * tpb + tpb,
                                                         l_blocks - 1))),
            # weights / biases: constant index map -> fetched once, stay resident
            pl.BlockSpec((N_LAYERS * KERNEL_SIZE, C, C), lambda n, l: (0, 0, 0)),
            pl.BlockSpec((N_LAYERS, C, 1), lambda n, l: (0, 0, 0)),
        ],
        out_specs=pl.BlockSpec((None, C, tile_l), lambda n, l: (n, 0, l)),
        compiler_params=pltpu.CompilerParams(
            dimension_semantics=("parallel", "parallel"),
            vmem_limit_bytes=32 * 1024 * 1024),
        cost_estimate=pl.CostEstimate(
            flops=flops, transcendentals=0, bytes_accessed=bytes_accessed),
    )(xp, xp, xp, w_taps, b_kern)

    return out if Lp == L else out[:, :, :L]


def _reference(x, weights, biases):
    """Pure-JAX reference matching the PyTorch forward exactly."""
    layer = 0
    for dr in DILATIONS:
        residual = x
        for d in dr:
            h = jnp.where(x > 0, x, SLOPE * x)
            pad = (KERNEL_SIZE - 1) * d // 2
            x = jax.lax.conv_general_dilated(
                h, weights[layer],
                window_strides=(1,),
                padding=[(pad, pad)],
                rhs_dilation=(d,),
                dimension_numbers=("NCH", "OIH", "NCH"),
            ) + biases[layer][None, :, None]
            layer += 1
        x = residual + x
    return x


if __name__ == "__main__":
    key = jax.random.PRNGKey(0)
    k_x, k_w, k_b = jax.random.split(key, 3)

    N, C, L = 2, CHANNELS, 256
    x = jax.random.normal(k_x, (N, C, L), dtype=jnp.float32)
    # deterministic "init" parameters (stacked over all conv layers)
    weights = 0.1 * jax.random.normal(
        k_w, (N_LAYERS, C, C, KERNEL_SIZE), dtype=jnp.float32)
    biases = 0.05 * jax.random.normal(k_b, (N_LAYERS, C), dtype=jnp.float32)

    # Tiled path: grid = (2 batch, 2 L-tiles), exercises halo reads + clamping.
    out = jax.block_until_ready(residual_block(x, weights, biases, tile_l=128))
    ref = _reference(x, weights, biases)
    np.testing.assert_allclose(np.asarray(out), np.asarray(ref),
                               rtol=1e-4, atol=1e-4)

    # Ragged length: exercises the padded tail + masked sequence edge.
    L2 = 192
    x2 = jax.random.normal(k_x, (N, C, L2), dtype=jnp.float32)
    out2 = jax.block_until_ready(residual_block(x2, weights, biases, tile_l=128))
    ref2 = _reference(x2, weights, biases)
    np.testing.assert_allclose(np.asarray(out2), np.asarray(ref2),
                               rtol=1e-4, atol=1e-4)

    print("KERNEL_OK")
</pallas_src>

<mosaic_0001>
module attributes {stable_mosaic.version = 11 : i64} {
  func.func @_residual_block_kernel(%arg0: i32, %arg1: i32, %arg2: memref<1x8x128xf32, #tpu.memory_space<vmem>>, %arg3: memref<1x8x128xf32, #tpu.memory_space<vmem>>, %arg4: memref<1x8x128xf32, #tpu.memory_space<vmem>>, %arg5: memref<9x8x8xf32, #tpu.memory_space<vmem>>, %arg6: memref<3x8x1xf32, #tpu.memory_space<vmem>>, %arg7: memref<1x8x128xf32, #tpu.memory_space<vmem>>) attributes {dimension_semantics = [#tpu.dimension_semantics<parallel>, #tpu.dimension_semantics<parallel>], iteration_bounds = array<i64: 2, 2>, scalar_prefetch = 0 : i64, scratch_operands = 0 : i64, tpu.core_type = #tpu.core_type<tc>, window_params = [{transform_indices = @transform_0, window_bounds = array<i64: 1, 8, 128>}, {transform_indices = @transform_1, window_bounds = array<i64: 1, 8, 128>}, {transform_indices = @transform_2, window_bounds = array<i64: 1, 8, 128>}, {pipeline_mode = #tpu.pipeline_mode<synchronous>, transform_indices = @transform_3, window_bounds = array<i64: 9, 8, 8>}, {pipeline_mode = #tpu.pipeline_mode<synchronous>, transform_indices = @transform_4, window_bounds = array<i64: 3, 8, 1>}, {transform_indices = @transform_5, window_bounds = array<i64: 1, 8, 128>}]} {
    %c128_i32 = arith.constant 128 : i32
    %0 = arith.muli %arg1, %c128_i32 : i32
    %c128_i32_0 = arith.constant 128 : i32
    %1 = arith.subi %0, %c128_i32_0 : i32
    %2 = tpu.iota {dimensions = array<i32: 1>} : vector<1x384xi32>
    %3 = vector.broadcast %1 : i32 to vector<1x384xi32>
    %4 = arith.addi %3, %2 : vector<1x384xi32>
    %c0 = arith.constant 0 : index
    %c0_1 = arith.constant 0 : index
    %c0_2 = arith.constant 0 : index
    %5 = vector.load %arg2[%c0, %c0_1, %c0_2] : memref<1x8x128xf32, #tpu.memory_space<vmem>>, vector<1x8x128xf32>
    %6 = vector.shape_cast %5 : vector<1x8x128xf32> to vector<8x128xf32>
    %c0_3 = arith.constant 0 : index
    %c0_4 = arith.constant 0 : index
    %c0_5 = arith.constant 0 : index
    %7 = vector.load %arg3[%c0_3, %c0_4, %c0_5] : memref<1x8x128xf32, #tpu.memory_space<vmem>>, vector<1x8x128xf32>
    %8 = vector.shape_cast %7 : vector<1x8x128xf32> to vector<8x128xf32>
    %c0_6 = arith.constant 0 : index
    %c0_7 = arith.constant 0 : index
    %c0_8 = arith.constant 0 : index
    %9 = vector.load %arg4[%c0_6, %c0_7, %c0_8] : memref<1x8x128xf32, #tpu.memory_space<vmem>>, vector<1x8x128xf32>
    %10 = vector.shape_cast %9 : vector<1x8x128xf32> to vector<8x128xf32>
    %11 = tpu.concatenate %6, %8, %10 in 1 : vector<8x128xf32>, vector<8x128xf32>, vector<8x128xf32> -> vector<8x384xf32>
    %c0_9 = arith.constant 0 : index
    %c0_10 = arith.constant 0 : index
    %c0_11 = arith.constant 0 : index
    %12 = vector.load %arg5[%c0_9, %c0_10, %c0_11] : memref<9x8x8xf32, #tpu.memory_space<vmem>>, vector<9x8x8xf32>
    %c0_12 = arith.constant 0 : index
    %c0_13 = arith.constant 0 : index
    %c0_14 = arith.constant 0 : index
    %13 = vector.load %arg6[%c0_12, %c0_13, %c0_14] : memref<3x8x1xf32, #tpu.memory_space<vmem>>, vector<3x8x1xf32>
    %cst = arith.constant 0.000000e+00 : f32
    %14 = vector.broadcast %cst : f32 to vector<8x384xf32>
    %15 = arith.cmpf ogt, %11, %14 : vector<8x384xf32>
    %cst_15 = arith.constant 1.000000e-01 : f32
    %16 = vector.broadcast %cst_15 : f32 to vector<8x384xf32>
    %17 = arith.mulf %16, %11 : vector<8x384xf32>
    %18 = arith.select %15, %11, %17 : vector<8x384xi1>, vector<8x384xf32>
    %c1_i32 = arith.constant 1 : i32
    %19 = vector.broadcast %c1_i32 : i32 to vector<1x384xi32>
    %20 = arith.cmpi sge, %4, %19 : vector<1x384xi32>
    %c1_i32_16 = arith.constant 1 : i32
    %21 = tpu.dynamic_rotate %18 by %c1_i32_16 dim 1 : vector<8x384xf32>, i32 -> vector<8x384xf32>
    %cst_17 = arith.constant 0.000000e+00 : f32
    %22 = vector.shape_cast %20 : vector<1x384xi1> to vector<1x384xi1>
    %23 = vector.broadcast %22 : vector<1x384xi1> to vector<8x384xi1>
    %24 = vector.broadcast %cst_17 : f32 to vector<8x384xf32>
    %25 = arith.select %23, %21, %24 : vector<8x384xi1>, vector<8x384xf32>
    %c255_i32 = arith.constant 255 : i32
    %26 = vector.broadcast %c255_i32 : i32 to vector<1x384xi32>
    %27 = arith.cmpi slt, %4, %26 : vector<1x384xi32>
    %c383_i32 = arith.constant 383 : i32
    %28 = tpu.dynamic_rotate %18 by %c383_i32 dim 1 : vector<8x384xf32>, i32 -> vector<8x384xf32>
    %cst_18 = arith.constant 0.000000e+00 : f32
    %29 = vector.shape_cast %27 : vector<1x384xi1> to vector<1x384xi1>
    %30 = vector.broadcast %29 : vector<1x384xi1> to vector<8x384xi1>
    %31 = vector.broadcast %cst_18 : f32 to vector<8x384xf32>
    %32 = arith.select %30, %28, %31 : vector<8x384xi1>, vector<8x384xf32>
    %33 = vector.extract_strided_slice %12 {offsets = [0, 0, 0], sizes = [1, 8, 8], strides = [1, 1, 1]} : vector<9x8x8xf32> to vector<1x8x8xf32>
    %34 = vector.shape_cast %33 : vector<1x8x8xf32> to vector<8x8xf32>
    %cst_19 = arith.constant dense<0.000000e+00> : vector<8x384xf32>
    %35 = tpu.matmul %34, %25, %cst_19 {dimension_numbers = #tpu.dot_dimension_numbers<[1], [0], [0], [1], [0, 0, 1, 1], [], []>} : vector<8x8xf32>, vector<8x384xf32>, vector<8x384xf32> -> vector<8x384xf32>
    %36 = vector.extract_strided_slice %12 {offsets = [1, 0, 0], sizes = [1, 8, 8], strides = [1, 1, 1]} : vector<9x8x8xf32> to vector<1x8x8xf32>
    %37 = vector.shape_cast %36 : vector<1x8x8xf32> to vector<8x8xf32>
    %cst_20 = arith.constant dense<0.000000e+00> : vector<8x384xf32>
    %38 = tpu.matmul %37, %18, %cst_20 {dimension_numbers = #tpu.dot_dimension_numbers<[1], [0], [0], [1], [0, 0, 1, 1], [], []>} : vector<8x8xf32>, vector<8x384xf32>, vector<8x384xf32> -> vector<8x384xf32>
    %39 = arith.addf %35, %38 : vector<8x384xf32>
    %40 = vector.extract_strided_slice %12 {offsets = [2, 0, 0], sizes = [1, 8, 8], strides = [1, 1, 1]} : vector<9x8x8xf32> to vector<1x8x8xf32>
    %41 = vector.shape_cast %40 : vector<1x8x8xf32> to vector<8x8xf32>
    %cst_21 = arith.constant dense<0.000000e+00> : vector<8x384xf32>
    %42 = tpu.matmul %41, %32, %cst_21 {dimension_numbers = #tpu.dot_dimension_numbers<[1], [0], [0], [1], [0, 0, 1, 1], [], []>} : vector<8x8xf32>, vector<8x384xf32>, vector<8x384xf32> -> vector<8x384xf32>
    %43 = arith.addf %39, %42 : vector<8x384xf32>
    %44 = vector.extract_strided_slice %13 {offsets = [0, 0, 0], sizes = [1, 8, 1], strides = [1, 1, 1]} : vector<3x8x1xf32> to vector<1x8x1xf32>
    %45 = vector.shape_cast %44 : vector<1x8x1xf32> to vector<8x1xf32>
    %46 = vector.broadcast %45 : vector<8x1xf32> to vector<8x384xf32>
    %47 = arith.addf %43, %46 : vector<8x384xf32>
    %cst_22 = arith.constant 0.000000e+00 : f32
    %48 = vector.broadcast %cst_22 : f32 to vector<8x384xf32>
    %49 = arith.cmpf ogt, %47, %48 : vector<8x384xf32>
    %cst_23 = arith.constant 1.000000e-01 : f32
    %50 = vector.broadcast %cst_23 : f32 to vector<8x384xf32>
    %51 = arith.mulf %50, %47 : vector<8x384xf32>
    %52 = arith.select %49, %47, %51 : vector<8x384xi1>, vector<8x384xf32>
    %c3_i32 = arith.constant 3 : i32
    %53 = vector.broadcast %c3_i32 : i32 to vector<1x384xi32>
    %54 = arith.cmpi sge, %4, %53 : vector<1x384xi32>
    %c3_i32_24 = arith.constant 3 : i32
    %55 = tpu.dynamic_rotate %52 by %c3_i32_24 dim 1 : vector<8x384xf32>, i32 -> vector<8x384xf32>
    %cst_25 = arith.constant 0.000000e+00 : f32
    %56 = vector.shape_cast %54 : vector<1x384xi1> to vector<1x384xi1>
    %57 = vector.broadcast %56 : vector<1x384xi1> to vector<8x384xi1>
    %58 = vector.broadcast %cst_25 : f32 to vector<8x384xf32>
    %59 = arith.select %57, %55, %58 : vector<8x384xi1>, vector<8x384xf32>
    %c253_i32 = arith.constant 253 : i32
    %60 = vector.broadcast %c253_i32 : i32 to vector<1x384xi32>
    %61 = arith.cmpi slt, %4, %60 : vector<1x384xi32>
    %c381_i32 = arith.constant 381 : i32
    %62 = tpu.dynamic_rotate %52 by %c381_i32 dim 1 : vector<8x384xf32>, i32 -> vector<8x384xf32>
    %cst_26 = arith.constant 0.000000e+00 : f32
    %63 = vector.shape_cast %61 : vector<1x384xi1> to vector<1x384xi1>
    %64 = vector.broadcast %63 : vector<1x384xi1> to vector<8x384xi1>
    %65 = vector.broadcast %cst_26 : f32 to vector<8x384xf32>
    %66 = arith.select %64, %62, %65 : vector<8x384xi1>, vector<8x384xf32>
    %67 = vector.extract_strided_slice %12 {offsets = [3, 0, 0], sizes = [1, 8, 8], strides = [1, 1, 1]} : vector<9x8x8xf32> to vector<1x8x8xf32>
    %68 = vector.shape_cast %67 : vector<1x8x8xf32> to vector<8x8xf32>
    %cst_27 = arith.constant dense<0.000000e+00> : vector<8x384xf32>
    %69 = tpu.matmul %68, %59, %cst_27 {dimension_numbers = #tpu.dot_dimension_numbers<[1], [0], [0], [1], [0, 0, 1, 1], [], []>} : vector<8x8xf32>, vector<8x384xf32>, vector<8x384xf32> -> vector<8x384xf32>
    %70 = vector.extract_strided_slice %12 {offsets = [4, 0, 0], sizes = [1, 8, 8], strides = [1, 1, 1]} : vector<9x8x8xf32> to vector<1x8x8xf32>
    %71 = vector.shape_cast %70 : vector<1x8x8xf32> to vector<8x8xf32>
    %cst_28 = arith.constant dense<0.000000e+00> : vector<8x384xf32>
    %72 = tpu.matmul %71, %52, %cst_28 {dimension_numbers = #tpu.dot_dimension_numbers<[1], [0], [0], [1], [0, 0, 1, 1], [], []>} : vector<8x8xf32>, vector<8x384xf32>, vector<8x384xf32> -> vector<8x384xf32>
    %73 = arith.addf %69, %72 : vector<8x384xf32>
    %74 = vector.extract_strided_slice %12 {offsets = [5, 0, 0], sizes = [1, 8, 8], strides = [1, 1, 1]} : vector<9x8x8xf32> to vector<1x8x8xf32>
    %75 = vector.shape_cast %74 : vector<1x8x8xf32> to vector<8x8xf32>
    %cst_29 = arith.constant dense<0.000000e+00> : vector<8x384xf32>
    %76 = tpu.matmul %75, %66, %cst_29 {dimension_numbers = #tpu.dot_dimension_numbers<[1], [0], [0], [1], [0, 0, 1, 1], [], []>} : vector<8x8xf32>, vector<8x384xf32>, vector<8x384xf32> -> vector<8x384xf32>
    %77 = arith.addf %73, %76 : vector<8x384xf32>
    %78 = vector.extract_strided_slice %13 {offsets = [1, 0, 0], sizes = [1, 8, 1], strides = [1, 1, 1]} : vector<3x8x1xf32> to vector<1x8x1xf32>
    %79 = vector.shape_cast %78 : vector<1x8x1xf32> to vector<8x1xf32>
    %80 = vector.broadcast %79 : vector<8x1xf32> to vector<8x384xf32>
    %81 = arith.addf %77, %80 : vector<8x384xf32>
    %82 = arith.addf %11, %81 : vector<8x384xf32>
    %cst_30 = arith.constant 0.000000e+00 : f32
    %83 = vector.broadcast %cst_30 : f32 to vector<8x384xf32>
    %84 = arith.cmpf ogt, %82, %83 : vector<8x384xf32>
    %cst_31 = arith.constant 1.000000e-01 : f32
    %85 = vector.broadcast %cst_31 : f32 to vector<8x384xf32>
    %86 = arith.mulf %85, %82 : vector<8x384xf32>
    %87 = arith.select %84, %82, %86 : vector<8x384xi1>, vector<8x384xf32>
    %c5_i32 = arith.constant 5 : i32
    %88 = vector.broadcast %c5_i32 : i32 to vector<1x384xi32>
    %89 = arith.cmpi sge, %4, %88 : vector<1x384xi32>
    %c5_i32_32 = arith.constant 5 : i32
    %90 = tpu.dynamic_rotate %87 by %c5_i32_32 dim 1 : vector<8x384xf32>, i32 -> vector<8x384xf32>
    %cst_33 = arith.constant 0.000000e+00 : f32
    %91 = vector.shape_cast %89 : vector<1x384xi1> to vector<1x384xi1>
    %92 = vector.broadcast %91 : vector<1x384xi1> to vector<8x384xi1>
    %93 = vector.broadcast %cst_33 : f32 to vector<8x384xf32>
    %94 = arith.select %92, %90, %93 : vector<8x384xi1>, vector<8x384xf32>
    %c251_i32 = arith.constant 251 : i32
    %95 = vector.broadcast %c251_i32 : i32 to vector<1x384xi32>
    %96 = arith.cmpi slt, %4, %95 : vector<1x384xi32>
    %c379_i32 = arith.constant 379 : i32
    %97 = tpu.dynamic_rotate %87 by %c379_i32 dim 1 : vector<8x384xf32>, i32 -> vector<8x384xf32>
    %cst_34 = arith.constant 0.000000e+00 : f32
    %98 = vector.shape_cast %96 : vector<1x384xi1> to vector<1x384xi1>
    %99 = vector.broadcast %98 : vector<1x384xi1> to vector<8x384xi1>
    %100 = vector.broadcast %cst_34 : f32 to vector<8x384xf32>
    %101 = arith.select %99, %97, %100 : vector<8x384xi1>, vector<8x384xf32>
    %102 = vector.extract_strided_slice %12 {offsets = [6, 0, 0], sizes = [1, 8, 8], strides = [1, 1, 1]} : vector<9x8x8xf32> to vector<1x8x8xf32>
    %103 = vector.shape_cast %102 : vector<1x8x8xf32> to vector<8x8xf32>
    %cst_35 = arith.constant dense<0.000000e+00> : vector<8x384xf32>
    %104 = tpu.matmul %103, %94, %cst_35 {dimension_numbers = #tpu.dot_dimension_numbers<[1], [0], [0], [1], [0, 0, 1, 1], [], []>} : vector<8x8xf32>, vector<8x384xf32>, vector<8x384xf32> -> vector<8x384xf32>
    %105 = vector.extract_strided_slice %12 {offsets = [7, 0, 0], sizes = [1, 8, 8], strides = [1, 1, 1]} : vector<9x8x8xf32> to vector<1x8x8xf32>
    %106 = vector.shape_cast %105 : vector<1x8x8xf32> to vector<8x8xf32>
    %cst_36 = arith.constant dense<0.000000e+00> : vector<8x384xf32>
    %107 = tpu.matmul %106, %87, %cst_36 {dimension_numbers = #tpu.dot_dimension_numbers<[1], [0], [0], [1], [0, 0, 1, 1], [], []>} : vector<8x8xf32>, vector<8x384xf32>, vector<8x384xf32> -> vector<8x384xf32>
    %108 = arith.addf %104, %107 : vector<8x384xf32>
    %109 = vector.extract_strided_slice %12 {offsets = [8, 0, 0], sizes = [1, 8, 8], strides = [1, 1, 1]} : vector<9x8x8xf32> to vector<1x8x8xf32>
    %110 = vector.shape_cast %109 : vector<1x8x8xf32> to vector<8x8xf32>
    %cst_37 = arith.constant dense<0.000000e+00> : vector<8x384xf32>
    %111 = tpu.matmul %110, %101, %cst_37 {dimension_numbers = #tpu.dot_dimension_numbers<[1], [0], [0], [1], [0, 0, 1, 1], [], []>} : vector<8x8xf32>, vector<8x384xf32>, vector<8x384xf32> -> vector<8x384xf32>
    %112 = arith.addf %108, %111 : vector<8x384xf32>
    %113 = vector.extract_strided_slice %13 {offsets = [2, 0, 0], sizes = [1, 8, 1], strides = [1, 1, 1]} : vector<3x8x1xf32> to vector<1x8x1xf32>
    %114 = vector.shape_cast %113 : vector<1x8x1xf32> to vector<8x1xf32>
    %115 = vector.broadcast %114 : vector<8x1xf32> to vector<8x384xf32>
    %116 = arith.addf %112, %115 : vector<8x384xf32>
    %117 = arith.addf %82, %116 : vector<8x384xf32>
    %118 = vector.extract_strided_slice %117 {offsets = [0, 128], sizes = [8, 128], strides = [1, 1]} : vector<8x384xf32> to vector<8x128xf32>
    %c0_38 = arith.constant 0 : index
    %c0_39 = arith.constant 0 : index
    %c0_40 = arith.constant 0 : index
    %119 = vector.load %arg7[%c0_38, %c0_39, %c0_40] : memref<1x8x128xf32, #tpu.memory_space<vmem>>, vector<1x8x128xf32>
    %120 = vector.shape_cast %119 : vector<1x8x128xf32> to vector<8x128xf32>
    %121 = vector.shape_cast %118 : vector<8x128xf32> to vector<1x8x128xf32>
    tpu.vector_store %arg7[%c0_38, %c0_39, %c0_40], %121 {strides = array<i32>} : memref<1x8x128xf32, #tpu.memory_space<vmem>>, vector<1x8x128xf32>,
    return
  }
  func.func @transform_0(%arg0: i32, %arg1: i32) -> (i32, i32, i32) {
    %c1_i32 = arith.constant 1 : i32
    %0 = arith.muli %arg1, %c1_i32 : i32
    %c1_i32_0 = arith.constant 1 : i32
    %1 = arith.subi %0, %c1_i32_0 : i32
    %c0_i32 = arith.constant 0 : i32
    %2 = arith.maxsi %1, %c0_i32 : i32
    %c0_i32_1 = arith.constant 0 : i32
    %c0_i32_2 = arith.constant 0 : i32
    return %arg0, %c0_i32_1, %2 : i32, i32, i32
  }
  func.func @transform_1(%arg0: i32, %arg1: i32) -> (i32, i32, i32) {
    %c0_i32 = arith.constant 0 : i32
    %c0_i32_0 = arith.constant 0 : i32
    return %arg0, %c0_i32, %arg1 : i32, i32, i32
  }
  func.func @transform_2(%arg0: i32, %arg1: i32) -> (i32, i32, i32) {
    %c1_i32 = arith.constant 1 : i32
    %0 = arith.muli %arg1, %c1_i32 : i32
    %c1_i32_0 = arith.constant 1 : i32
    %1 = arith.addi %0, %c1_i32_0 : i32
    %c1_i32_1 = arith.constant 1 : i32
    %2 = arith.minsi %1, %c1_i32_1 : i32
    %c0_i32 = arith.constant 0 : i32
    %c0_i32_2 = arith.constant 0 : i32
    return %arg0, %c0_i32, %2 : i32, i32, i32
  }
  func.func @transform_3(%arg0: i32, %arg1: i32) -> (i32, i32, i32) {
    %c0_i32 = arith.constant 0 : i32
    %c0_i32_0 = arith.constant 0 : i32
    %c0_i32_1 = arith.constant 0 : i32
    %c0_i32_2 = arith.constant 0 : i32
    return %c0_i32, %c0_i32_0, %c0_i32_1 : i32, i32, i32
  }
  func.func @transform_4(%arg0: i32, %arg1: i32) -> (i32, i32, i32) {
    %c0_i32 = arith.constant 0 : i32
    %c0_i32_0 = arith.constant 0 : i32
    %c0_i32_1 = arith.constant 0 : i32
    %c0_i32_2 = arith.constant 0 : i32
    return %c0_i32, %c0_i32_0, %c0_i32_1 : i32, i32, i32
  }
  func.func @transform_5(%arg0: i32, %arg1: i32) -> (i32, i32, i32) {
    %c0_i32 = arith.constant 0 : i32
    %c0_i32_0 = arith.constant 0 : i32
    return %arg0, %c0_i32, %arg1 : i32, i32, i32
  }
}

</mosaic_0001>

<bundles_post_ra>
// kernel: tpu_custom_call.1
= control target key start
LH: loop header
LB: loop body
LE: loop exit
PB: predicated region body
PF: predicated region fallthrough
CT: control target
= control target key end

     0   :  { %s2401_s0 = inlined_call_operand.vmem [shape: f32[2,8,256], index: 0, kind: input, shape index: {}]   ;;  %s2402_s1 = inlined_call_operand.vmem [shape: f32[2,8,256], index: 1, kind: input, shape index: {}]   ;;  %s2403_s2 = inlined_call_operand.vmem [shape: f32[2,8,256], index: 2, kind: input, shape index: {}]   ;;  %s2404_s3 = inlined_call_operand.vmem [shape: f32[9,8,8], index: 3, kind: input, shape index: {}]   ;;  %s2405_s4 = inlined_call_operand.vmem [shape: f32[3,8,1], index: 4, kind: input, shape index: {}]   ;;  %s2406_s5 = inlined_call_operand.hbm [shape: f32[2,8,256], index: 5, kind: output, shape index: {}]  }
   0x1   :  { %2408 = sst [smem:[#allocation6_spill]] %s2403_s2 }
   0x2   :  { %10 = vsyncpa [#allocation3], 0 }
   0x3   :  { %12 = vsyncpa [#allocation3 + $0x1], 0  ;;  %s2105_s18 = smov 0   ;;  %s2107_s19 = smov 0  }
   0x4   :  { %s2109_s20 = smov 0   ;;  %s2111_s21 = smov 0  }
   0x5   :  { %s2113_s22 = smov 0   ;;  %s2115_s23 = smov 0  }
   0x6   :  { %s2117_s24 = smov 0   ;;  %s2119_s25 = smov 0  }
   0x7 LB: > { %s1774_s26 = sadd.s32 4294967295, %s2063_s25   ;;  %s1775_s27 = sadd.s32 4294967294, %s2063_s25   ;;  %s2063_s25 = sphi %s2119_s25, %s18_s25   ;;  %s2059_s24 = sphi %s2117_s24, %s2420_s24   ;;  %s2055_s23 = sphi %s2115_s23, %s2419_s23   ;;  %s2051_s22 = sphi %s2113_s22, %s2418_s22   ;;  %s2047_s21 = sphi %s2111_s21, %s2417_s21   ;;  %s2043_s20 = sphi %s2109_s20, %s2416_s20   ;;  %s2039_s19 = sphi %s2107_s19, %s2415_s19   ;;  %s2035_s18 = sphi %s2105_s18, %s2414_s18  }
   0x8   : > { %s27_s28 = sadd.s32 1, %s2055_s23  ;;  %s30_s29 = sadd.s32 1, %s2059_s24 }
   0x9   : > { %p28_p0 = scmp.ge.s32.totalorder %s27_s28, 2  ;;  %p187_p1 = scmp.ne.s32.totalorder %s2043_s20, %s2039_s19 }
   0xa   : > { %p188_p2 = scmp.eq.s32.totalorder %s1774_s26, 3  ;;  %p193_p5 = scmp.ne.s32.totalorder %s2039_s19, %s2035_s18 }
   0xb   : > { %s2422_s28 = smov (%p28_p0, %s27_s28), 0  ;;  %s2424_s29 = smov (!%p28_p0, %s30_s29), %s2059_s24 }
   0xc   : > { %s173_s30 = ssub.s32 %s2055_s23, %s2422_s28  ;;  %p2156_p3 = por %p188_p2, %p187_p1 }
   0xd   : > { %p32_p4 = scmp.ge.s32.totalorder %s2424_s29, 2  ;;  %p194_p6 = scmp.eq.s32.totalorder %s1775_s27, 3 }
   0xe   : > { %p1780_p7 = scmp.ge.s32.totalorder %s2063_s25, 1  ;;  %p263_p9 = scmp.lt.s32.totalorder %s2063_s25, 5 }
   0xf   : > { %s2426_s29 = smov (%p32_p4, %s2424_s29), 0  ;;  %p2165_p8 = por %p194_p6, %p193_p5 }
  0x10   : > { %2410 = sst [smem:[#allocation5_spill]] %s2426_s29  ;;  %s172_s8 = ssub.s32 %s2059_s24, %s2426_s29 }
  0x11   : > { %s177_s9 = sadd.s32 1, %s2043_s20  ;;  %s174_s10 = sor.u32 %s173_s30, %s172_s8 }
  0x12   : > { %p264_p10 = pnand %p1780_p7, %p263_p9  ;;  %p175_p11 = scmp.eq.s32.totalorder %s174_s10, 0 }
  0x13   : > { %p319_p12 = scmp.lt.s32.totalorder (!%p264_p10), %s2051_s22, 1  ;;  %s338_s12 = sadd.s32 (!%p264_p10), 1, %s2047_s21  ;;  %v2065_v0 = vmov (!%p264_p10), 0.0   ;;  %vm2066_vm0 = vmmov (!%p264_p10), 0   ;;  %v366_v4 = vld [vmem:[%s2404_s3 + $0x8] sm:$0xff] (!%p264_p10)  ;;  %vm430_vm2 = vcmask (!%p264_p10), 64512   ;;  %v354_v13 = vlaneseq (!%p264_p10) }
  0x14   : > { %s2174_s11 = scalar_select %p175_p11, %s2043_s20, %s177_s9  }
  0x15   : > { %267 = sbr.rel (%p264_p10) target bundleno = 1097 (0x449), region = 40  ;;  %p339_p13 = scmp.lt.s32.totalorder (!%p264_p10), %s338_s12, 1  ;;  %498 = vmatprep.mubr.f32.mxu0 (!%p264_p10), %v2065_v0  ;;  %1849 = vmatprep.subr.mxu1 (!%p264_p10), %v2065_v0  ;;  %v2069_v11 = vmov (!%p264_p10), 0   ;;  %v374_v12 = vld [vmem:[%s2405_s4] sm:$0xff] (!%p264_p10)  ;;  %v2226_v14 = vand.u32 (!%p264_p10), 127, %v354_v13  ;;  %v367_v32 = vld [vmem:[%s2404_s3 + $0x10] sm:$0xff] (!%p264_p10) }
  0x16   : > { %s1782_s15 = sadd.s32 (!%p264_p10), 4294967295, %s2047_s21  ;;  %p332_p1 = scmp.lt.s32.totalorder (!%p264_p10), %s2047_s21, 1  ;;  %1851 = vmatprep.mubr.msk.f32.mxu1 (!%p264_p10), %vm2066_vm0, %v2065_v0  ;;  %1967 = vset.pattern.permute.xlu0 (!%p264_p10), %v2069_v11  ;;  %v365_v25 = vld [vmem:[%s2404_s3] sm:$0xff] (!%p264_p10)  ;;  %v375_v56 = vld [vmem:[%s2405_s4 + $0x8] sm:$0xff] (!%p264_p10)  ;;  %v368_v60 = vld [vmem:[%s2404_s3 + $0x18] sm:$0xff] (!%p264_p10) }
  0x17   : > { %p317_p0 = scmp.gt.s32.totalorder (!%p264_p10), %s1782_s15, 0  ;;  %p1783_p2 = scmp.lt.s32.totalorder (!%p264_p10), %s1782_s15, 1  ;;  %1968 = vset.pattern.permute.xlu1 (!%p264_p10), %v2069_v11  ;;  %v356_v16 = vadd.s32 (!%p264_p10), 128, %v2226_v14  ;;  %v357_v17 = vadd.s32 (!%p264_p10), 256, %v2226_v14  ;;  %vm395_vm5 = vcmp.lt.s32.totalorder (!%p264_p10), %v2226_v14, 1  ;;  %vm417_vm9 = vcmp.lt.s32.totalorder (!%p264_p10), %v2226_v14, 127 }
  0x18   : > { %s2412_s2 = sld [smem:[#allocation6_spill]] (!%p264_p10)  ;;  %s2067_s10 = smov (!%p264_p10), 1   ;;  %v369_v52 = vld [vmem:[%s2404_s3 + $0x20] sm:$0xff] (!%p264_p10) }
  0x19   : > { %s2068_s29 = smov (!%p264_p10), 127  }
  0x1c   : > { %s320_s13 = scalar_select %p319_p12, %s2051_s22, 1 }
  0x1d   : > { %s2428_s12 = smov (!%p339_p13, %s338_s12), 1  ;;  %s2432_s15 = smov (!%p317_p0, %s1782_s15), 0 }
  0x1e   : > { %s1788_s14 = sshll.u32 %s320_s13, 1  ;;  %s2430_s12 = smov (!%p339_p13, %s2428_s12), 1 }
  0x1f   : > { %s346_s16 = sadd.s32 %s1788_s14, %s2430_s12  ;;  %s2434_s15 = smov (!%p1783_p2, %s2432_s15), 1 }
  0x20   : > { %s1796_s17 = sshll.u32 %s346_s16, 3  ;;  %s324_s12 = sadd.s32 %s2434_s15, %s1788_s14 }
  0x21   : > { %s348_s30 = scalar_lea.vmem %s2412_s2, %s1796_s17  ;;  %s1789_s26 = sshll.u32 %s324_s12, 3 }
  0x22   : > { %v2188_v1 = vld [vmem:[%s348_s30] sm:$0xff]  ;;  %s333_s8 = scalar_select %p332_p1, %s2047_s21, 1 }
  0x23   : > { %vm379_vm1 = vcmp.gt.f32.partialorder %v2188_v1, 0.0  ;;  %v382_v2 = vmul.f32 0.1, %v2188_v1  ;;  %s2073_s17 = smov 123   ;;  %s2074_s30 = smov [#allocation2]  }
  0x24   : > { %s335_s9 = sadd.s32 %s1788_s14, %s333_s8  ;;  %s326_s14 = scalar_lea.vmem %s2401_s0, %s1789_s26 }
  0x25   : > { %v385_v3 = vsel %vm379_vm1, %v2188_v1, %v382_v2  ;;  %s1791_s13 = sshll.u32 %s335_s9, 3  ;;  %v2210_v6 = vld [vmem:[%s326_s14] sm:$0xff]  ;;  %s1797_s9 = sshll.u32 %s2047_s21, 7  ;;  %vm892_vm1 = vcmp.lt.s32.totalorder %v2226_v14, 3 }
  0x26   : > { %393 = vrot.lane.b32.xlu1 %v385_v3, %s2067_s10  ;;  %1850 = vmatpush3.msra.mxu1 %v385_v3  ;;  %s337_s2 = scalar_lea.vmem %s2402_s1, %s1791_s13  ;;  %vm377_vm4 = vcmp.gt.f32.partialorder %v2210_v6, 0.0  ;;  %v380_v8 = vmul.f32 0.1, %v2210_v6  ;;  %s1798_s12 = sadd.s32 4294967168, %s1797_s9 }
  0x27   : > { %1852 = vmatmul.mubr.msk.f32.vlgmr.msra.gmra.mrb[0].mxu1 %vm430_vm2, %v366_v4  ;;  %1854 = vmatprep.subr.mxu1 %v2065_v0  ;;  %v2206_v5 = vld [vmem:[%s337_s2] sm:$0xff]  ;;  %v358_v18 = vstv %s1798_s12  ;;  %s2070_s26 = smov 3   ;;  %s2071_s8 = smov 125  }
  0x28   : > { %1856 = vmatprep.mubr.msk.f32.mxu1 %vm2066_vm0, %v2065_v0  ;;  %vm378_vm3 = vcmp.gt.f32.partialorder %v2206_v5, 0.0  ;;  %v381_v7 = vmul.f32 0.1, %v2206_v5  ;;  %v383_v10 = vsel %vm377_vm4, %v2210_v6, %v380_v8  ;;  %v2230_v20 = vadd.s32 %v358_v18, %v356_v16  ;;  %v370_v8 = vld [vmem:[%s2404_s3 + $0x28] sm:$0xff]  ;;  %s313_s2 = sand.u32 1, %s2039_s19   ;;  %s1831_s9 = sshll.u32 %s2051_s22, 1 }
  0x29   : > { %389 = vrot.lane.b32.xlu0 %v383_v10, %s2067_s10  ;;  %v2232_v21 = vadd.s32 %v358_v18, %v357_v17  ;;  %v2235_v23 = vadd.s32 %v358_v18, %v2226_v14  ;;  %s1781_s15 = sshll.u32 %s313_s2, 3  ;;  %s1656_s12 = sadd.s32 %s2047_s21, %s1831_s9 }
  0x2a   : > { %v384_v9 = vsel %vm378_vm3, %v2206_v5, %v381_v7  ;;  %vm387_vm6 = vcmp.ge.s32.totalorder %v2230_v20, 1  ;;  %vm409_vm10 = vcmp.lt.s32.totalorder %v2230_v20, 255  ;;  %vm884_vm3 = vcmp.ge.s32.totalorder %v2230_v20, 3  ;;  %s315_s13 = scalar_lea.vmem [#allocation2], %s1781_s15  ;;  %s1645_s21 = scalar_lea.sflag [#allocation3], %s313_s2 }
  0x2b   : > { %413 = vrot.lane.b32.xlu1 %v384_v9, %s2068_s29  ;;  %434 = vmatprep.subr.mxu0 %v384_v9  ;;  %vm388_vm7 = vcmp.ge.s32.totalorder %v2232_v21, 1  ;;  %vm386_vm8 = vcmp.ge.s32.totalorder %v2235_v23, 1  ;;  %vm410_vm11 = vcmp.lt.s32.totalorder %v2232_v21, 255  ;;  %vm408_vm12 = vcmp.lt.s32.totalorder %v2235_v23, 255  ;;  %s1660_s16 = sshll.u32 %s315_s13, 4  ;;  %s2350_s16 = int_to_ptr.vmem [resolvable:$true] %s1660_s16 }
  0x2c   : > { %435 = vmatpush1.msra.mxu0 %v383_v10  ;;  %vm885_vm4 = vcmp.ge.s32.totalorder %v2232_v21, 3  ;;  %s1969_s22 = scalar_lea.vmem %s2350_s16, 128 }
  0x2d   : > { %1799 = vmatmul.mubr.msk.f32.vlgmr.msra.gmra.mrb[0].mxu0 %vm430_vm2, %v366_v4  ;;  %391 = vrot.lane.b32.xlu0 %v384_v9, %s2067_s10  ;;  %s2072_s10 = smov 5   ;;  %p1970_p4 = scmp.ne.s32.totalorder %s2350_s16, %s1969_s22 }
  0x2e   : > { %642 = vmatprep.mubr.f32.mxu0 %v2065_v0 }
  0x2f   : > { %411 = vrot.lane.b32.xlu1 %v383_v10, %s2068_s29  ;;  %p1971_p5 = pnand %p1970_p4, %p2156_p3 }
  0x31   : > { %415 = vrot.lane.b32.xlu0 %v385_v3, %s2068_s29  ;;  %p1972_p6 = pneg %p1971_p5 }
  0x35   : > { %868 = vperm.xlu0 %1967, %v374_v12  }
  0x98   : > { %v394_v15 = vpop.permute.xlu1 %393 }
  0x9b   : > { %v390_v22 = vpop.permute.xlu0 %389 }
  0x9c   : > { %v398_v29 = vsel %vm395_vm5, %v394_v15, %v390_v22 }
  0x9d   : > { %v414_v19 = vpop.permute.xlu1 %413 }
  0x9f   : > { %v392_v24 = vpop.permute.xlu0 %391 }
  0xa0   : > { %v396_v26 = vsel %vm395_vm5, %v392_v24, %v394_v15  ;;  %v397_v27 = vsel %vm395_vm5, %v390_v22, %v392_v24  ;;  %vm883_vm5 = vcmp.ge.s32.totalorder %v2235_v23, 3 }
  0xa1   : > { %v412_v28 = vpop.permute.xlu1 %411  ;;  %1801 = vmatprep.subr.msk.mxu0 %vm387_vm6, %v397_v27  ;;  %1855 = vmatpush3.msk.msra.mxu1 %vm388_vm7, %v396_v26  ;;  %vm914_vm6 = vcmp.lt.s32.totalorder %v2226_v14, 125  ;;  %vm906_vm7 = vcmp.lt.s32.totalorder %v2230_v20, 253 }
  0xa2   : > { %1802 = vmatpush1.msk.msra.mxu0 %vm386_vm8, %v398_v29  ;;  %1857 = vmatmul.mubr.msk.f32.vlgmr.msra.gmra.mrb[2].mxu1 %vm430_vm2, %v365_v25  ;;  %v419_v30 = vsel %vm417_vm9, %v412_v28, %v414_v19  ;;  %vm905_vm8 = vcmp.lt.s32.totalorder %v2235_v23, 253 }
  0xa3   : > { %v416_v31 = vpop.permute.xlu0 %415  ;;  %1803 = vmatmul.mubr.msk.f32.vlgmr.msra.gmra.mrb[0].mxu0 %vm430_vm2, %v365_v25  ;;  %1859 = vmatprep.subr.mxu1 %v2065_v0 }
  0xa4   : > { %v418_v33 = vsel %vm417_vm9, %v414_v19, %v416_v31  ;;  %v420_v34 = vsel %vm417_vm9, %v416_v31, %v412_v28  ;;  %1861 = vmatprep.mubr.msk.f32.mxu1 %vm2066_vm0, %v2065_v0  ;;  %786 = vmatprep.mubr.f32.mxu0 %v2065_v0  ;;  %vm907_vm9 = vcmp.lt.s32.totalorder %v2232_v21, 253 }
  0xa5   : > { %1806 = vmatprep.subr.msk.mxu0 %vm409_vm10, %v418_v33  ;;  %1860 = vmatpush3.msk.msra.mxu1 %vm410_vm11, %v420_v34 }
  0xa6   : > { %1807 = vmatpush1.msk.msra.mxu0 %vm408_vm12, %v419_v30  ;;  %1862 = vmatmul.mubr.msk.f32.vlgmr.msra.gmra.mrb[4].mxu1 %vm430_vm2, %v367_v32  ;;  %vm1390_vm12 = vcmp.lt.s32.totalorder %v2226_v14, 5 }
  0xa7   : > { %1864 = vmatprep.subr.mxu1 %v2065_v0  ;;  %1866 = vmatprep.mubr.msk.f32.mxu1 %vm2066_vm0, %v2065_v0 }
  0xab   : > { %1808 = vmatmul.mubr.msk.f32.vlgmr.msra.gmra.mrb[0].mxu0 %vm430_vm2, %v367_v32 }
  0xac   : > { %994 = vmatprep.mubr.f32.mxu0 %v2065_v0 }
  0xb4   : > { %v869_v41 = vpop.permute.xlu0 %868 }
  0xfa   : > { %v571_v35 = vpop.f32.mrb[0].mxu1 }
  0xfb   : > { %v1853_v36 = vpop.f32.mrb[1].mxu1 }
 0x175   : > { %v715_v37 = vpop.f32.mrb[2].mxu1 }
 0x176   : > { %v716_v38 = vadd.f32 %v715_v37, %v571_v35  ;;  %v1858_v39 = vpop.f32.mrb[3].mxu1 }
 0x179   : > { %v859_v40 = vpop.f32.mrb[4].mxu1 }
 0x17a   : > { %v865_v42 = vadd.f32 %v859_v40, %v716_v38  ;;  %v1863_v43 = vpop.f32.mrb[5].mxu1 }
 0x17c   : > { %v873_v44 = vadd.f32 %v869_v41, %v865_v42 }
 0x17e   : > { %v788_v45 = vpop.f32.mrb[0].mxu0  ;;  %vm876_vm13 = vcmp.gt.f32.partialorder %v873_v44, 0.0  ;;  %v879_v46 = vmul.f32 0.1, %v873_v44 }
 0x17f   : > { %v871_v47 = vadd.f32 %v869_v41, %v788_v45  ;;  %v790_v48 = vpop.f32.mrb[1].mxu0 }
 0x180   : > { %v872_v49 = vadd.f32 %v869_v41, %v790_v48  ;;  %v882_v50 = vsel %vm876_vm13, %v873_v44, %v879_v46  ;;  %vm1383_vm13 = vcmp.ge.s32.totalorder %v2230_v20, 5  ;;  %v373_v46 = vld [vmem:[%s2404_s3 + $0x40] sm:$0xff] }
 0x181   : > { %v877_v51 = vmul.f32 0.1, %v871_v47  ;;  %890 = vrot.lane.b32.xlu0 %v882_v50, %s2070_s26  ;;  %1865 = vmatpush3.msra.mxu1 %v882_v50  ;;  %vm874_vm14 = vcmp.gt.f32.partialorder %v871_v47, 0.0 }
 0x182   : > { %v878_v53 = vmul.f32 0.1, %v872_v49  ;;  %vm875_vm15 = vcmp.gt.f32.partialorder %v872_v49, 0.0  ;;  %1869 = vmatprep.subr.mxu1 %v2065_v0  ;;  %1867 = vmatmul.mubr.msk.f32.vlgmr.msra.gmra.mrb[6].mxu1 %vm430_vm2, %v369_v52 }
 0x183   : > { %v880_v54 = vsel %vm874_vm14, %v871_v47, %v877_v51  ;;  %1871 = vmatprep.mubr.msk.f32.mxu1 %vm2066_vm0, %v2065_v0  ;;  %vm1382_vm14 = vcmp.ge.s32.totalorder %v2235_v23, 5 }
 0x184   : > { %886 = vrot.lane.b32.xlu1 %v880_v54, %s2070_s26  ;;  %v881_v55 = vsel %vm875_vm15, %v872_v49, %v878_v53  ;;  %vm1407_vm15 = vcmp.lt.s32.totalorder %v2226_v14, 123 }
 0x185   : > { %912 = vrot.lane.b32.xlu0 %v882_v50, %s2071_s8  ;;  %930 = vmatprep.subr.mxu0 %v881_v55 }
 0x186   : > { %931 = vmatpush1.msra.mxu0 %v880_v54 }
 0x187   : > { %1811 = vmatmul.mubr.msk.f32.vlgmr.msra.gmra.mrb[2].mxu0 %vm430_vm2, %v369_v52 }
 0x188   : > { %888 = vrot.lane.b32.xlu1 %v881_v55, %s2070_s26  ;;  %1138 = vmatprep.mubr.f32.mxu0 %v2065_v0 }
 0x189   : > { %1364 = vperm.xlu0 %1967, %v375_v56  }
 0x18c   : > { %910 = vrot.lane.b32.xlu1 %v881_v55, %s2071_s8 }
 0x190   : > { %908 = vrot.lane.b32.xlu1 %v880_v54, %s2071_s8  ;;  %s1973_s8 = sshll.u32 %s2074_s30, 4  ;;  %s1974_s8 = int_to_ptr.vmem [resolvable:$false] %s1973_s8 }
 0x191   : > { %s1975_s14 = scalar_lea.vmem %s1974_s8, 256  ;;  %p1976_p7 = scmp.lt.s32.totalorder %s2350_s16, %s1974_s8 }
 0x192   : > { %p1977_p9 = scmp.lt.s32.totalorder %s1975_s14, %s1969_s22 }
 0x194   : > { %p1978_p10 = por %p1977_p9, %p1976_p7 }
 0x196   : > { %p1979_p11 = pnand %p1978_p10, %p1972_p6 }
 0x1f3   : > { %v891_v58 = vpop.permute.xlu0 %890 }
 0x1f6   : > { %v887_v57 = vpop.permute.xlu1 %886 }
 0x1f7   : > { %v895_v63 = vsel %vm892_vm1, %v891_v58, %v887_v57  ;;  %v913_v2 = vpop.permute.xlu0 %912 }
 0x1fa   : > { %v889_v59 = vpop.permute.xlu1 %888 }
 0x1fb   : > { %v893_v61 = vsel %vm892_vm1, %v889_v59, %v891_v58  ;;  %v894_v62 = vsel %vm892_vm1, %v887_v57, %v889_v59  ;;  %vm1400_vm1 = vcmp.lt.s32.totalorder %v2230_v20, 251 }
 0x1fc   : > { %1813 = vmatprep.subr.msk.mxu0 %vm884_vm3, %v894_v62  ;;  %1870 = vmatpush3.msk.msra.mxu1 %vm885_vm4, %v893_v61  ;;  %vm1399_vm3 = vcmp.lt.s32.totalorder %v2235_v23, 251 }
 0x1fd   : > { %1814 = vmatpush1.msk.msra.mxu0 %vm883_vm5, %v895_v63  ;;  %1872 = vmatmul.mubr.msk.f32.vlgmr.msra.gmra.mrb[8].mxu1 %vm430_vm2, %v368_v60 }
 0x1fe   : > { %v911_v3 = vpop.permute.xlu1 %910  ;;  %1815 = vmatmul.mubr.msk.f32.vlgmr.msra.gmra.mrb[2].mxu0 %vm430_vm2, %v368_v60  ;;  %1874 = vmatprep.subr.mxu1 %v2065_v0 }
 0x1ff   : > { %v915_v4 = vsel %vm914_vm6, %v911_v3, %v913_v2  ;;  %1876 = vmatprep.mubr.msk.f32.mxu1 %vm2066_vm0, %v2065_v0  ;;  %1282 = vmatprep.mubr.f32.mxu0 %v2065_v0 }
 0x200   : > { %1818 = vmatprep.subr.msk.mxu0 %vm906_vm7, %v915_v4 }
 0x202   : > { %v909_v7 = vpop.permute.xlu1 %908 }
 0x203   : > { %v916_v9 = vsel %vm914_vm6, %v909_v7, %v911_v3  ;;  %v917_v10 = vsel %vm914_vm6, %v913_v2, %v909_v7 }
 0x204   : > { %1819 = vmatpush1.msk.msra.mxu0 %vm905_vm8, %v916_v9  ;;  %1875 = vmatpush3.msk.msra.mxu1 %vm907_vm9, %v917_v10 }
 0x205   : > { %1877 = vmatmul.mubr.msk.f32.vlgmr.msra.gmra.mrb[10].mxu1 %vm430_vm2, %v370_v8 }
 0x206   : > { %1820 = vmatmul.mubr.msk.f32.vlgmr.msra.gmra.mrb[2].mxu0 %vm430_vm2, %v370_v8  ;;  %1556 = vmatprep.mubr.f32.mxu1 %v2065_v0 }
 0x207   : > { %1483 = vmatprep.mubr.f32.mxu0 %v2065_v0 }
 0x208   : > { %v1365_v17 = vpop.permute.xlu0 %1364 }
 0x255   : > { %v1067_v11 = vpop.f32.mrb[6].mxu1 }
 0x256   : > { %v1868_v12 = vpop.f32.mrb[7].mxu1 }
 0x2d0   : > { %v1211_v13 = vpop.f32.mrb[8].mxu1 }
 0x2d1   : > { %v1212_v15 = vadd.f32 %v1211_v13, %v1067_v11  ;;  %v1873_v16 = vpop.f32.mrb[9].mxu1 }
 0x2d8   : > { %v1355_v18 = vpop.f32.mrb[10].mxu1 }
 0x2d9   : > { %v1361_v19 = vadd.f32 %v1355_v18, %v1212_v15  ;;  %v1284_v21 = vpop.f32.mrb[2].mxu0  ;;  %v1878_v22 = vpop.f32.mrb[11].mxu1 }
 0x2da   : > { %v1367_v24 = vadd.f32 %v1365_v17, %v1284_v21  ;;  %v1286_v25 = vpop.f32.mrb[3].mxu0 }
 0x2db   : > { %v1369_v26 = vadd.f32 %v1365_v17, %v1361_v19  ;;  %v1368_v27 = vadd.f32 %v1365_v17, %v1286_v25 }
 0x2dc   : > { %v1370_v28 = vadd.f32 %v1367_v24, %v2210_v6  ;;  %v376_v6 = vld [vmem:[%s2405_s4 + $0x10] sm:$0xff] }
 0x2dd   : > { %v1372_v29 = vadd.f32 %v1369_v26, %v2188_v1  ;;  %v2314_v30 = vadd.f32 %v1368_v27, %v2206_v5  ;;  %v372_v1 = vld [vmem:[%s2404_s3 + $0x38] sm:$0xff] }
 0x2de   : > { %v1376_v31 = vmul.f32 0.1, %v1370_v28  ;;  %vm1373_vm11 = vcmp.gt.f32.partialorder %v1370_v28, 0.0 }
 0x2df   : > { %vm1375_vm0 = vcmp.gt.f32.partialorder %v1372_v29, 0.0  ;;  %v1378_v32 = vmul.f32 0.1, %v1372_v29  ;;  %vm1374_vm10 = vcmp.gt.f32.partialorder %v2314_v30, 0.0  ;;  %v1377_v33 = vmul.f32 0.1, %v2314_v30 }
 0x2e0   : > { %v1379_v5 = vsel %vm1373_vm11, %v1370_v28, %v1376_v31 }
 0x2e1   : > { %v1381_v34 = vsel %vm1375_vm0, %v1372_v29, %v1378_v32  ;;  %v1380_v35 = vsel %vm1374_vm10, %v2314_v30, %v1377_v33 }
 0x2e2   : > { %1388 = vrot.lane.b32.xlu1 %v1381_v34, %s2072_s10  ;;  %1386 = vrot.lane.b32.xlu0 %v1380_v35, %s2072_s10 }
 0x2e3   : > { %1419 = vmatprep.subr.mxu0 %v1380_v35 }
 0x2e4   : > { %1420 = vmatpush1.msra.mxu0 %v1379_v5 }
 0x2e5   : > { %1823 = vmatmul.mubr.msk.f32.vlgmr.msra.gmra.mrb[4].mxu0 %vm430_vm2, %v372_v1 }
 0x2e6   : > { %1384 = vrot.lane.b32.xlu1 %v1379_v5, %s2072_s10  ;;  %1403 = vrot.lane.b32.xlu0 %v1380_v35, %s2073_s17  ;;  %s1832_s10 = sshll.u32 %s1656_s12, 7 }
 0x2e7   : > { %1629 = vmatprep.mubr.f32.mxu0 %v2065_v0  ;;  %v371_v0 = vld [vmem:[%s2404_s3 + $0x30] sm:$0xff]  ;;  %s2348_s27 = scalar_lea.hbm %s2406_s5, %s1832_s10 }
 0x2ea   : > { %1405 = vrot.lane.b32.xlu1 %v1381_v34, %s2073_s17  ;;  %1401 = vrot.lane.b32.xlu0 %v1379_v5, %s2073_s17 }
 0x2ee   : > { %1638 = vperm.xlu1 %1968, %v376_v6  }
 0x354   : > { %v1389_v36 = vpop.permute.xlu1 %1388  ;;  %v1387_v37 = vpop.permute.xlu0 %1386 }
 0x358   : > { %v1385_v38 = vpop.permute.xlu1 %1384  ;;  %v1404_v39 = vpop.permute.xlu0 %1403 }
 0x359   : > { %v1391_v40 = vsel %vm1390_vm12, %v1385_v38, %v1387_v37  ;;  %v1392_v41 = vsel %vm1390_vm12, %v1389_v36, %v1385_v38 }
 0x35a   : > { %1824 = vmatprep.subr.msk.mxu1 %vm1383_vm13, %v1391_v40 }
 0x35b   : > { %1825 = vmatpush1.msk.msra.mxu1 %vm1382_vm14, %v1392_v41 }
 0x35c   : > { %v1406_v42 = vpop.permute.xlu1 %1405  ;;  %v1402_v43 = vpop.permute.xlu0 %1401  ;;  %1826 = vmatmul.mubr.msk.f32.vlgmr.msra.gmra.mrb[12].mxu1 %vm430_vm2, %v371_v0 }
 0x35d   : > { %v1408_v44 = vsel %vm1407_vm15, %v1404_v39, %v1406_v42  ;;  %v1409_v45 = vsel %vm1407_vm15, %v1402_v43, %v1404_v39 }
 0x35e   : > { %1827 = vmatprep.subr.msk.mxu0 %vm1400_vm1, %v1408_v44 }
 0x35f   : > { %1828 = vmatpush1.msk.msra.mxu0 %vm1399_vm3, %v1409_v45 }
 0x360   : > { %1829 = vmatmul.mubr.msk.f32.vlgmr.msra.gmra.mrb[6].mxu0 %vm430_vm2, %v373_v46 }
 0x36d   : > { %v1639_v51 = vpop.permute.xlu1 %1638 }
 0x3b8   : > { %v1485_v14 = vpop.f32.mrb[4].mxu0 }
 0x3b9   : > { %v1486_v20 = vpop.f32.mrb[5].mxu0 }
 0x42f   : > { %v1558_v47 = vpop.f32.mrb[12].mxu1 }
 0x430   : > { %v1559_v48 = vpop.f32.mrb[13].mxu1 }
 0x431   : > { %v1560_v49 = vadd.f32 %v1559_v48, %v1486_v20 }
 0x433   : > { %v1631_v23 = vpop.f32.mrb[6].mxu0 }
 0x434   : > { %v1632_v50 = vpop.f32.mrb[7].mxu0 }
 0x435   : > { %v1635_v52 = vadd.f32 %v1632_v50, %v1560_v49 }
 0x437   : > { %v1641_v53 = vadd.f32 %v1639_v51, %v1635_v52 }
 0x439   : > { %v1642_v54 = vadd.f32 %v1641_v53, %v2314_v30 }
 0x43b   : > { %1643 = vst [vmem:[%s315_s13] sm:$0xff] %v1642_v54 }
 0x43c   : > { %1982 = shalt.err (!%p1979_p11)
}
 0x43d   : > { %s1983_s29 = scalar_lea.hbm %s2348_s27, 128  ;;  %s1987_s9 = scalar_lea.hbm %s2406_s5, 512 }
 0x43e   : > { %p1984_p12 = scmp.ne.s32.totalorder %s2348_s27, %s1983_s29  ;;  %p1988_p1 = scmp.lt.u32.totalorder %s2348_s27, %s2406_s5 }
 0x43f   : > { %p1989_p2 = scmp.lt.u32.totalorder %s1987_s9, %s1983_s29  ;;  %p1991_p5 = scmp.lt.u32.totalorder %s1983_s29, %s2348_s27 }
 0x440   : > { %p1985_p13 = pnand %p1984_p12, %p2156_p3 }
 0x441   : > { %p1990_p4 = por %p1989_p2, %p1988_p1 }
 0x442   : > { %p1986_p0 = pneg %p1985_p13 }
 0x443   : > { %p1992_p6 = por %p1991_p5, %p1990_p4 }
 0x445   : > { %p1993_p7 = pnand %p1992_p6, %p1986_p0 }
 0x447   : > { %1996 = shalt.err (!%p1993_p7)
}
 0x448   : > { %1887 = dma.vmem_to_hbm [thread:$0]  (%p2156_p3), %s2350_s16, 128, %s2348_s27, %s1645_s21  }
 0x449 PF: > { %p1893_p9 = scmp.ge.s32.totalorder %s2063_s25, 2  ;;  %s1672_s13 = sand.u32 1, %s2035_s18  }
 0x44a   : > { %s1673_s17 = scalar_lea.sflag [#allocation3], %s1672_s13 }
 0x44b   : > { %p1890_p10 = pnand %p1893_p9, %p2165_p8 }
 0x44d   : > { %2030 = dma.done.wait (!%p1890_p10), %s1673_s17, 128  }
 0x44e   : > { %2032 = vsyncadd (!%p1890_p10), %s1673_s17, 4294967168  ;;  %s18_s25 = sadd.s32 1, %s2063_s25   ;;  %s2413_s6 = sld [smem:[#allocation5_spill]] }
 0x44f   : > { %p15_p11 = scmp.ge.s32.totalorder %s18_s25, 6   ;;  %s2414_s18 = smov %s2039_s19 }
 0x450   : > { %s2415_s19 = smov %s2043_s20  ;;  %s2416_s20 = smov %s2174_s11 }
 0x451   : > { %s2417_s21 = smov %s2055_s23  ;;  %s2418_s22 = smov %s2059_s24 }
 0x452   : > { %s2419_s23 = smov %s2422_s28  ;;  %17 = sbr.rel (!%p15_p11) target bundleno = 7 (0x7), region = 81 }
 0x454   : > { %s2420_s24 = smov %s2413_s6 }
 0x459   :  { %1678 = vsyncpa [#allocation3], 1 }
 0x45a   :  { %1680 = vsyncpa [#allocation3 + $0x1], 1 }

</bundles_post_ra>
